<compile_context>
chip_gen: v6e
topology: v6e:2x2x1
jax: 0.10.0
libtpu: 0.0.40
codegen_flags: <defaults>
</compile_context>

<pallas_src>
import functools

import jax
import jax.numpy as jnp
from jax.experimental import pallas as pl
from jax.experimental.pallas import tpu as pltpu


def _round_up(n, m):
    return ((n + m - 1) // m) * m


def _policy_kernel(ab_ref, x_ref, w1_ref, b1_ref, w2_ref, b2_ref, out_ref):
    # fc1 on the MXU: bf16 x bf16 -> f32 accumulation.
    h = jnp.dot(x_ref[...], w1_ref[...], preferred_element_type=jnp.float32)
    h = jnp.maximum(h + b1_ref[...], 0.0)          # (TB, Hp) + (1, Hp), f32 VPU
    # fc2: cast the MXU operand only; accumulate in f32.
    a = jnp.dot(h.astype(jnp.bfloat16), w2_ref[...],
                preferred_element_type=jnp.float32)
    a = a + b2_ref[...]                            # (TB, Ap) + (1, Ap), f32
    bound = ab_ref[0, 0]                           # SMEM scalar
    out_ref[...] = (jnp.tanh(a) * bound).astype(out_ref.dtype)


@functools.partial(jax.jit, static_argnames=("tile_b",))
def policy_net_forward(x, w1, b1, w2, b2, action_bound, *, tile_b=128):
    """x: (B, state_dim); w1: (state_dim, hidden); b1: (1, hidden);
       w2: (hidden, action_dim); b2: (1, action_dim); action_bound: scalar."""
    batch, state_dim = x.shape
    hidden = w1.shape[1]
    action_dim = w2.shape[1]

    hidden_p = _round_up(hidden, 128)       # lane-dense intermediate
    act_p = _round_up(action_dim, 128)      # lane-dense output store
    batch_p = _round_up(batch, tile_b)

    # Zero-padding + bf16 cast (exact: padded units are dead).
    xp = jnp.pad(x.astype(jnp.bfloat16), ((0, batch_p - batch), (0, 0)))
    w1p = jnp.pad(w1.astype(jnp.bfloat16), ((0, 0), (0, hidden_p - hidden)))
    b1p = jnp.pad(b1.astype(jnp.float32), ((0, 0), (0, hidden_p - hidden)))
    w2p = jnp.pad(w2.astype(jnp.bfloat16),
                  ((0, hidden_p - hidden), (0, act_p - action_dim)))
    b2p = jnp.pad(b2.astype(jnp.float32), ((0, 0), (0, act_p - action_dim)))
    ab = jnp.asarray(action_bound, jnp.float32).reshape(1, 1)

    grid = (batch_p // tile_b,)
    out_p = pl.pallas_call(
        _policy_kernel,
        out_shape=jax.ShapeDtypeStruct((batch_p, act_p), jnp.float32),
        grid=grid,
        in_specs=[
            # action_bound scalar lives in SMEM, whole-array (no tiling).
            pl.BlockSpec(memory_space=pltpu.MemorySpace.SMEM),
            # x: tiled along batch, streamed / double-buffered.
            pl.BlockSpec((tile_b, state_dim), lambda i: (i, 0)),
            # Weights / biases: constant block index -> VMEM-resident.
            pl.BlockSpec((state_dim, hidden_p), lambda i: (0, 0)),
            pl.BlockSpec((1, hidden_p), lambda i: (0, 0)),
            pl.BlockSpec((hidden_p, act_p), lambda i: (0, 0)),
            pl.BlockSpec((1, act_p), lambda i: (0, 0)),
        ],
        out_specs=pl.BlockSpec((tile_b, act_p), lambda i: (i, 0)),
        compiler_params=pltpu.CompilerParams(
            dimension_semantics=("parallel",),
        ),
    )(ab, xp, w1p, b1p, w2p, b2p)

    return out_p[:batch, :action_dim]


def init_params(key, state_dim, hidden_dim, action_dim):
    """Deterministic, PyTorch-Linear-style (uniform +/- 1/sqrt(fan_in)) init.
    Weights stored pre-transposed ([in_dim, out_dim]) vs torch's (out, in)."""
    k1, k2, k3, k4 = jax.random.split(key, 4)
    lim1 = 1.0 / jnp.sqrt(state_dim)
    lim2 = 1.0 / jnp.sqrt(hidden_dim)
    w1 = jax.random.uniform(k1, (state_dim, hidden_dim), jnp.float32, -lim1, lim1)
    b1 = jax.random.uniform(k2, (1, hidden_dim), jnp.float32, -lim1, lim1)
    w2 = jax.random.uniform(k3, (hidden_dim, action_dim), jnp.float32, -lim2, lim2)
    b2 = jax.random.uniform(k4, (1, action_dim), jnp.float32, -lim2, lim2)
    return w1, b1, w2, b2


if __name__ == "__main__":
    # Shapes implied by the module: state vector -> hidden -> action.
    # batch=256 exercises the batch grid (2 tiles of 128) while staying small.
    batch, state_dim, hidden_dim, action_dim = 256, 16, 32, 4
    action_bound = 2.0

    key = jax.random.PRNGKey(0)
    kx, kp = jax.random.split(key)
    x = jax.random.normal(kx, (batch, state_dim), jnp.float32)
    w1, b1, w2, b2 = init_params(kp, state_dim, hidden_dim, action_dim)

    out = policy_net_forward(x, w1, b1, w2, b2, action_bound)
    out = jax.block_until_ready(out)
    assert out.shape == (batch, action_dim)

    # Reference 1: same bf16 rounding of MXU operands, f32 accumulation (tight).
    xb = x.astype(jnp.bfloat16).astype(jnp.float32)
    w1b = w1.astype(jnp.bfloat16).astype(jnp.float32)
    w2b = w2.astype(jnp.bfloat16).astype(jnp.float32)
    h = jnp.maximum(xb @ w1b + b1, 0.0)
    ref_bf16 = jnp.tanh(h.astype(jnp.bfloat16).astype(jnp.float32) @ w2b + b2) * action_bound
    assert jnp.allclose(out, ref_bf16, atol=1e-4, rtol=1e-4)

    # Reference 2: pure f32 math (loose tolerance: bf16 inputs on the MXU path).
    ref_f32 = jnp.tanh(jnp.maximum(x @ w1 + b1, 0.0) @ w2 + b2) * action_bound
    assert jnp.allclose(out, ref_f32, atol=2e-2, rtol=2e-2)

    print("KERNEL_OK")
</pallas_src>

<mosaic_0001>
module attributes {stable_mosaic.version = 11 : i64} {
  func.func @_policy_kernel(%arg0: i32, %arg1: memref<1x1xf32, #tpu.memory_space<smem>>, %arg2: memref<128x16xbf16, #tpu.memory_space<vmem>>, %arg3: memref<16x128xbf16, #tpu.memory_space<vmem>>, %arg4: memref<1x128xf32, #tpu.memory_space<vmem>>, %arg5: memref<128x128xbf16, #tpu.memory_space<vmem>>, %arg6: memref<1x128xf32, #tpu.memory_space<vmem>>, %arg7: memref<128x128xf32, #tpu.memory_space<vmem>>) attributes {dimension_semantics = [#tpu.dimension_semantics<parallel>], iteration_bounds = array<i64: 2>, scalar_prefetch = 0 : i64, scratch_operands = 0 : i64, tpu.core_type = #tpu.core_type<tc>, window_params = [{transform_indices = @transform_0, window_bounds = array<i64: 1, 1>}, {transform_indices = @transform_1, window_bounds = array<i64: 128, 16>}, {pipeline_mode = #tpu.pipeline_mode<synchronous>, transform_indices = @transform_2, window_bounds = array<i64: 16, 128>}, {pipeline_mode = #tpu.pipeline_mode<synchronous>, transform_indices = @transform_3, window_bounds = array<i64: 1, 128>}, {pipeline_mode = #tpu.pipeline_mode<synchronous>, transform_indices = @transform_4, window_bounds = array<i64: 128, 128>}, {pipeline_mode = #tpu.pipeline_mode<synchronous>, transform_indices = @transform_5, window_bounds = array<i64: 1, 128>}, {transform_indices = @transform_6, window_bounds = array<i64: 128, 128>}]} {
    %c0 = arith.constant 0 : index
    %c0_0 = arith.constant 0 : index
    %0 = vector.load %arg2[%c0, %c0_0] : memref<128x16xbf16, #tpu.memory_space<vmem>>, vector<128x16xbf16>
    %c0_1 = arith.constant 0 : index
    %c0_2 = arith.constant 0 : index
    %1 = vector.load %arg3[%c0_1, %c0_2] : memref<16x128xbf16, #tpu.memory_space<vmem>>, vector<16x128xbf16>
    %cst = arith.constant dense<0.000000e+00> : vector<128x128xf32>
    %2 = tpu.matmul %0, %1, %cst {dimension_numbers = #tpu.dot_dimension_numbers<[1], [0], [0], [1], [0, 0, 1, 1], [], []>} : vector<128x16xbf16>, vector<16x128xbf16>, vector<128x128xf32> -> vector<128x128xf32>
    %c0_3 = arith.constant 0 : index
    %c0_4 = arith.constant 0 : index
    %3 = vector.load %arg4[%c0_3, %c0_4] : memref<1x128xf32, #tpu.memory_space<vmem>>, vector<1x128xf32>
    %4 = vector.broadcast %3 : vector<1x128xf32> to vector<128x128xf32>
    %5 = arith.addf %2, %4 : vector<128x128xf32>
    %cst_5 = arith.constant 0.000000e+00 : f32
    %6 = vector.broadcast %cst_5 : f32 to vector<128x128xf32>
    %7 = arith.maximumf %5, %6 : vector<128x128xf32>
    %8 = arith.truncf %7 : vector<128x128xf32> to vector<128x128xbf16>
    %c0_6 = arith.constant 0 : index
    %c0_7 = arith.constant 0 : index
    %9 = vector.load %arg5[%c0_6, %c0_7] : memref<128x128xbf16, #tpu.memory_space<vmem>>, vector<128x128xbf16>
    %cst_8 = arith.constant dense<0.000000e+00> : vector<128x128xf32>
    %10 = tpu.matmul %8, %9, %cst_8 {dimension_numbers = #tpu.dot_dimension_numbers<[1], [0], [0], [1], [0, 0, 1, 1], [], []>} : vector<128x128xbf16>, vector<128x128xbf16>, vector<128x128xf32> -> vector<128x128xf32>
    %c0_9 = arith.constant 0 : index
    %c0_10 = arith.constant 0 : index
    %11 = vector.load %arg6[%c0_9, %c0_10] : memref<1x128xf32, #tpu.memory_space<vmem>>, vector<1x128xf32>
    %12 = vector.broadcast %11 : vector<1x128xf32> to vector<128x128xf32>
    %13 = arith.addf %10, %12 : vector<128x128xf32>
    %c0_11 = arith.constant 0 : index
    %c0_12 = arith.constant 0 : index
    %14 = memref.load %arg1[%c0_11, %c0_12] : memref<1x1xf32, #tpu.memory_space<smem>>
    %15 = math.tanh %13 : vector<128x128xf32>
    %16 = vector.broadcast %14 : f32 to vector<128x128xf32>
    %17 = arith.mulf %15, %16 : vector<128x128xf32>
    %c0_13 = arith.constant 0 : index
    %c0_14 = arith.constant 0 : index
    %18 = vector.load %arg7[%c0_13, %c0_14] : memref<128x128xf32, #tpu.memory_space<vmem>>, vector<128x128xf32>
    tpu.vector_store %arg7[%c0_13, %c0_14], %17 {strides = array<i32>} : memref<128x128xf32, #tpu.memory_space<vmem>>, vector<128x128xf32>,
    return
  }
  func.func @transform_0(%arg0: i32) -> (i32, i32) {
    %c0_i32 = arith.constant 0 : i32
    %c0_i32_0 = arith.constant 0 : i32
    %c0_i32_1 = arith.constant 0 : i32
    return %c0_i32, %c0_i32_0 : i32, i32
  }
  func.func @transform_1(%arg0: i32) -> (i32, i32) {
    %c0_i32 = arith.constant 0 : i32
    %c0_i32_0 = arith.constant 0 : i32
    return %arg0, %c0_i32 : i32, i32
  }
  func.func @transform_2(%arg0: i32) -> (i32, i32) {
    %c0_i32 = arith.constant 0 : i32
    %c0_i32_0 = arith.constant 0 : i32
    %c0_i32_1 = arith.constant 0 : i32
    return %c0_i32, %c0_i32_0 : i32, i32
  }
  func.func @transform_3(%arg0: i32) -> (i32, i32) {
    %c0_i32 = arith.constant 0 : i32
    %c0_i32_0 = arith.constant 0 : i32
    %c0_i32_1 = arith.constant 0 : i32
    return %c0_i32, %c0_i32_0 : i32, i32
  }
  func.func @transform_4(%arg0: i32) -> (i32, i32) {
    %c0_i32 = arith.constant 0 : i32
    %c0_i32_0 = arith.constant 0 : i32
    %c0_i32_1 = arith.constant 0 : i32
    return %c0_i32, %c0_i32_0 : i32, i32
  }
  func.func @transform_5(%arg0: i32) -> (i32, i32) {
    %c0_i32 = arith.constant 0 : i32
    %c0_i32_0 = arith.constant 0 : i32
    %c0_i32_1 = arith.constant 0 : i32
    return %c0_i32, %c0_i32_0 : i32, i32
  }
  func.func @transform_6(%arg0: i32) -> (i32, i32) {
    %c0_i32 = arith.constant 0 : i32
    %c0_i32_0 = arith.constant 0 : i32
    return %arg0, %c0_i32 : i32, i32
  }
}

</mosaic_0001>

<bundles_post_ra>
// kernel: policy_net_forward.1
= control target key start
LH: loop header
LB: loop body
LE: loop exit
PB: predicated region body
PF: predicated region fallthrough
CT: control target
= control target key end

     0   :  { %s980_s23 = smov 0   ;;  %s1106_s0 = inlined_call_operand.<no memory space> [shape: f32[1,1], index: 0, kind: input, shape index: {}]   ;;  %s1107_s1 = inlined_call_operand.vmem [shape: bf16[256,16], index: 1, kind: input, shape index: {}]   ;;  %s1108_s2 = inlined_call_operand.vmem [shape: bf16[16,128], index: 2, kind: input, shape index: {}]   ;;  %s1109_s3 = inlined_call_operand.vmem [shape: f32[1,128], index: 3, kind: input, shape index: {}]   ;;  %s1110_s4 = inlined_call_operand.vmem [shape: bf16[128,128], index: 4, kind: input, shape index: {}]   ;;  %s1111_s5 = inlined_call_operand.vmem [shape: f32[1,128], index: 5, kind: input, shape index: {}]   ;;  %s1112_s6 = inlined_call_operand.vmem [shape: f32[256,128], index: 6, kind: output, shape index: {}]  }
   0x1   :  { %11 = sst [smem:[#allocation2]] %s1106_s0 }
   0x2 LB: > { %s748_s24 = sadd.s32 4294967295, %s940_s23   ;;  %p752_p0 = scmp.ge.s32.totalorder %s940_s23, 1  ;;  %s940_s23 = sphi %s980_s23, %s17_s23  }
   0x3   : > { %p214_p1 = scmp.lt.s32.totalorder %s940_s23, 3 }
   0x5   : > { %p215_p2 = pnand %p752_p0, %p214_p1 }
   0x6   : > { %s753_s0 = sshll.u32 (!%p215_p2), %s748_s24, 4  ;;  %s642_s28 = sld [smem:[#allocation2]] (!%p215_p2) }
   0x7   : > { %218 = sbr.rel (%p215_p2) target bundleno = 465 (0x1d1), region = 44  ;;  %p245_p3 = scmp.lt.s32.totalorder (!%p215_p2), %s753_s0, 31 }
   0xc   : > { %v885_v0 = vld [vmem:[%s1108_s2] sm:$0xff]   ;;  %v894_v1 = vld [vmem:[%s1110_s4 + $0x38] sm:$0xff]   ;;  %s1114_s0 = smov (!%p245_p3, %s753_s0), 31  ;;  %v895_v2 = vld [vmem:[%s1110_s4 + $0x30] sm:$0xff]   ;;  %vm328_vm0 = vcmask 130048  }
   0xd   : > { %811 = vmatprep.subr.bf16.mxu0 %v885_v0  ;;  %861 = vmatprep.subr.bf16.mxu1 %v894_v1  ;;  %s754_s7 = sshll.u32 %s1114_s0, 2  ;;  %v896_v3 = vld [vmem:[%s1110_s4 + $0x28] sm:$0xff]   ;;  %v897_v7 = vld [vmem:[%s1110_s4 + $0x20] sm:$0xff]   ;;  %v898_v10 = vld [vmem:[%s1110_s4 + $0x18] sm:$0xff]   ;;  %s756_s29 = sshll.u32 %s1114_s0, 3 }
   0xe   : > { %812 = vmatpush3.bf16.msra.mxu0 %v885_v0  ;;  %869 = vmatpush3.bf16.msra.mxu1 %v894_v1  ;;  %s1003_s10 = scalar_lea.vmem %s1107_s1, %s754_s7  ;;  %v899_v14 = vld [vmem:[%s1110_s4 + $0x10] sm:$0xff]   ;;  %v900_v15 = vld [vmem:[%s1110_s4 + $0x8] sm:$0xff]   ;;  %v901_v16 = vld [vmem:[%s1110_s4] sm:$0xff]   ;;  %s1061_s8 = scalar_lea.vmem %s1112_s6, %s756_s29 }
   0xf   : > { %829 = vmatprep.subr.bf16.mxu0 %v894_v1  ;;  %862 = vmatprep.subr.bf16.mxu1 %v895_v2  ;;  %v886_v4 = vld [vmem:[%s1003_s10] sm:$0xff]   ;;  %v887_v5 = vld [vmem:[%s1003_s10 + $0x8] sm:$0xff]   ;;  %v888_v6 = vld [vmem:[%s1003_s10 + $0x10] sm:$0xff]  }
  0x10   : > { %813 = vmatprep.mubr.msk.bf16.mxu0 %vm328_vm0, %v886_v4  ;;  %v889_v8 = vld [vmem:[%s1003_s10 + $0x18] sm:$0xff]   ;;  %v890_v9 = vld [vmem:[%s1003_s10 + $0x20] sm:$0xff]   ;;  %v891_v11 = vld [vmem:[%s1003_s10 + $0x28] sm:$0xff]  }
  0x11   : > { %814 = vmatmul.mubr.msk.bf16.vlgmr.msra.gmra.mxu0 %vm328_vm0, %v887_v5  ;;  %v892_v12 = vld [vmem:[%s1003_s10 + $0x30] sm:$0xff]   ;;  %v893_v13 = vld [vmem:[%s1003_s10 + $0x38] sm:$0xff]   ;;  %v757_v19 = vld [vmem:[%s1109_s3] ss:$0 sm:$0xff] }
  0x12   : > { %870 = vmatpush3.bf16.msra.mxu1 %v895_v2  ;;  %817 = vmatprep.mubr.msk.bf16.mxu0 %vm328_vm0, %v888_v6 }
  0x13   : > { %863 = vmatprep.subr.bf16.mxu1 %v896_v3  ;;  %830 = vmatpush3.bf16.msra.mxu0 %v894_v1 }
  0x14   : > { %831 = vmatprep.subr.bf16.mxu0 %v895_v2 }
  0x16   : > { %871 = vmatpush3.bf16.msra.mxu1 %v896_v3 }
  0x17   : > { %864 = vmatprep.subr.bf16.mxu1 %v897_v7  ;;  %832 = vmatpush3.bf16.msra.mxu0 %v895_v2 }
  0x18   : > { %833 = vmatprep.subr.bf16.mxu0 %v896_v3 }
  0x19   : > { %818 = vmatmul.mubr.msk.bf16.gmra.mxu0 %vm328_vm0, %v889_v8 }
  0x1a   : > { %872 = vmatpush3.bf16.msra.mxu1 %v897_v7  ;;  %821 = vmatprep.mubr.msk.bf16.mxu0 %vm328_vm0, %v890_v9 }
  0x1b   : > { %865 = vmatprep.subr.bf16.mxu1 %v898_v10  ;;  %834 = vmatpush3.bf16.msra.mxu0 %v896_v3 }
  0x1c   : > { %835 = vmatprep.subr.bf16.mxu0 %v897_v7 }
  0x1e   : > { %873 = vmatpush3.bf16.msra.mxu1 %v898_v10 }
  0x1f   : > { %836 = vmatpush3.bf16.msra.mxu0 %v897_v7  ;;  %866 = vmatprep.subr.bf16.mxu1 %v899_v14 }
  0x20   : > { %837 = vmatprep.subr.bf16.mxu0 %v898_v10 }
  0x21   : > { %822 = vmatmul.mubr.msk.bf16.gmra.mxu0 %vm328_vm0, %v891_v11 }
  0x22   : > { %825 = vmatprep.mubr.msk.bf16.mxu0 %vm328_vm0, %v892_v12  ;;  %874 = vmatpush3.bf16.msra.mxu1 %v899_v14 }
  0x23   : > { %838 = vmatpush3.bf16.msra.mxu0 %v898_v10  ;;  %867 = vmatprep.subr.bf16.mxu1 %v900_v15  ;;  %v1045_v10 = vld [vmem:[%s1111_s5] ss:$0 sm:$0xff] }
  0x24   : > { %839 = vmatprep.subr.bf16.mxu0 %v899_v14 }
  0x26   : > { %875 = vmatpush3.bf16.msra.mxu1 %v900_v15 }
  0x27   : > { %840 = vmatpush3.bf16.msra.mxu0 %v899_v14  ;;  %868 = vmatprep.subr.bf16.mxu1 %v901_v16 }
  0x28   : > { %841 = vmatprep.subr.bf16.mxu0 %v900_v15 }
  0x29   : > { %826 = vmatmul.mubr.msk.bf16.gmra.mxu0 %vm328_vm0, %v893_v13 }
  0x2a   : > { %876 = vmatpush3.bf16.msra.mxu1 %v901_v16 }
  0x2b   : > { %842 = vmatpush3.bf16.msra.mxu0 %v900_v15 }
  0x2c   : > { %843 = vmatprep.subr.bf16.mxu0 %v901_v16 }
  0x2f   : > { %844 = vmatpush3.bf16.msra.mxu0 %v901_v16 }
  0xd1   : > { %v815_v17 = vpop.f32.mrf.mxu0 }
  0xd2   : > { %v396_v23 = vadd.f32 %v815_v17, %v757_v19 }
  0xd3   : > { %v387_v18 = vpop.f32.mrf.mxu0 }
  0xd4   : > { %v388_v21 = vadd.f32 %v757_v19, %v387_v18  ;;  %v452_v30 = vmax.f32 %v396_v23, 0.0 }
  0xd5   : > { %v816_v20 = vpop.f32.mrf.mxu0 }
  0xd6   : > { %v399_v22 = vadd.f32 %v816_v20, %v757_v19  ;;  %v450_v28 = vmax.f32 %v388_v21, 0.0 }
  0xd7   : > { %v390_v24 = vpop.f32.mrf.mxu0 }
  0xd8   : > { %v391_v25 = vadd.f32 %v757_v19, %v390_v24  ;;  %v453_v26 = vmax.f32 %v399_v22, 0.0 }
  0xd9   : > { %v819_v27 = vpop.f32.mrf.mxu0 }
  0xda   : > { %v451_v29 = vmax.f32 %v391_v25, 0.0  ;;  %v467_v33 = vpack.c.bf16 %v453_v26, %v452_v30  ;;  %v412_v37 = vadd.f32 %v819_v27, %v757_v19  ;;  %v1055_v25 = vstv %s642_s28 }
  0xdb   : > { %v403_v31 = vpop.f32.mrf.mxu0 }
  0xdc   : > { %v466_v32 = vpack.c.bf16 %v451_v29, %v450_v28  ;;  %v404_v35 = vadd.f32 %v757_v19, %v403_v31  ;;  %v456_v44 = vmax.f32 %v412_v37, 0.0 }
  0xdd   : > { %v820_v34 = vpop.f32.mrf.mxu0 }
  0xde   : > { %v415_v36 = vadd.f32 %v820_v34, %v757_v19  ;;  %845 = vmatprep.mubr.bf16.mxu0 %v466_v32  ;;  %v454_v42 = vmax.f32 %v404_v35, 0.0 }
  0xdf   : > { %v406_v38 = vpop.f32.mrf.mxu0  ;;  %846 = vmatmul.mubr.bf16.vlgmr.msra.gmra.mxu0 %v467_v33 }
  0xe0   : > { %v407_v39 = vadd.f32 %v757_v19, %v406_v38  ;;  %v457_v40 = vmax.f32 %v415_v36, 0.0 }
  0xe1   : > { %v823_v41 = vpop.f32.mrf.mxu0 }
  0xe2   : > { %v455_v43 = vmax.f32 %v407_v39, 0.0  ;;  %v469_v47 = vpack.c.bf16 %v457_v40, %v456_v44  ;;  %v428_v51 = vadd.f32 %v823_v41, %v757_v19 }
  0xe3   : > { %v419_v45 = vpop.f32.mrf.mxu0 }
  0xe4   : > { %v468_v46 = vpack.c.bf16 %v455_v43, %v454_v42  ;;  %v420_v49 = vadd.f32 %v757_v19, %v419_v45  ;;  %v460_v58 = vmax.f32 %v428_v51, 0.0 }
  0xe5   : > { %v824_v48 = vpop.f32.mrf.mxu0 }
  0xe6   : > { %v431_v50 = vadd.f32 %v824_v48, %v757_v19  ;;  %849 = vmatprep.mubr.bf16.mxu1 %v468_v46  ;;  %v458_v56 = vmax.f32 %v420_v49, 0.0 }
  0xe7   : > { %v422_v52 = vpop.f32.mrf.mxu0  ;;  %850 = vmatmul.mubr.bf16.vlgmr.msra.gmra.mxu1 %v469_v47 }
  0xe8   : > { %v423_v53 = vadd.f32 %v757_v19, %v422_v52  ;;  %v461_v54 = vmax.f32 %v431_v50, 0.0 }
  0xe9   : > { %v827_v55 = vpop.f32.mrf.mxu0 }
  0xea   : > { %v459_v57 = vmax.f32 %v423_v53, 0.0  ;;  %v471_v61 = vpack.c.bf16 %v461_v54, %v460_v58  ;;  %v444_v1 = vadd.f32 %v827_v55, %v757_v19 }
  0xeb   : > { %v435_v59 = vpop.f32.mrf.mxu0 }
  0xec   : > { %v470_v60 = vpack.c.bf16 %v459_v57, %v458_v56  ;;  %v436_v63 = vadd.f32 %v757_v19, %v435_v59  ;;  %v464_v7 = vmax.f32 %v444_v1, 0.0 }
  0xed   : > { %v828_v62 = vpop.f32.mrf.mxu0 }
  0xee   : > { %v447_v0 = vadd.f32 %v828_v62, %v757_v19  ;;  %853 = vmatprep.mubr.bf16.mxu1 %v470_v60  ;;  %v462_v5 = vmax.f32 %v436_v63, 0.0 }
  0xef   : > { %v438_v2 = vpop.f32.mrf.mxu0  ;;  %854 = vmatmul.mubr.bf16.gmra.mxu1 %v471_v61 }
  0xf0   : > { %v439_v3 = vadd.f32 %v757_v19, %v438_v2  ;;  %v465_v4 = vmax.f32 %v447_v0, 0.0 }
  0xf2   : > { %v463_v6 = vmax.f32 %v439_v3, 0.0  ;;  %v473_v9 = vpack.c.bf16 %v465_v4, %v464_v7 }
  0xf4   : > { %v472_v8 = vpack.c.bf16 %v463_v6, %v462_v5 }
  0xf6   : > { %857 = vmatprep.mubr.bf16.mxu1 %v472_v8 }
  0xf7   : > { %858 = vmatmul.mubr.bf16.gmra.mxu1 %v473_v9 }
 0x19f   : > { %v847_v11 = vpop.f32.mrf.mxu0 }
 0x1a0   : > { %v588_v12 = vadd.f32 %v847_v11, %v1045_v10 }
 0x1a1   : > { %v579_v13 = vpop.f32.mrf.mxu0 }
 0x1a2   : > { %902 = vtanh.f32 %v588_v12  ;;  %v580_v14 = vadd.f32 %v1045_v10, %v579_v13 }
 0x1a3   : > { %v848_v15 = vpop.f32.mrf.mxu0 }
 0x1a4   : > { %904 = vtanh.f32 %v580_v14  ;;  %v591_v16 = vadd.f32 %v848_v15, %v1045_v10 }
 0x1a5   : > { %v582_v17 = vpop.f32.mrf.mxu0 }
 0x1a6   : > { %906 = vtanh.f32 %v591_v16  ;;  %v583_v18 = vadd.f32 %v1045_v10, %v582_v17 }
 0x1a7   : > { %v851_v19 = vpop.f32.mrf.mxu1 }
 0x1a8   : > { %908 = vtanh.f32 %v583_v18  ;;  %v604_v20 = vadd.f32 %v851_v19, %v1045_v10 }
 0x1a9   : > { %v595_v21 = vpop.f32.mrf.mxu1 }
 0x1aa   : > { %910 = vtanh.f32 %v604_v20  ;;  %v596_v22 = vadd.f32 %v1045_v10, %v595_v21 }
 0x1ab   : > { %v852_v23 = vpop.f32.mrf.mxu1 }
 0x1ac   : > { %912 = vtanh.f32 %v596_v22  ;;  %v607_v24 = vadd.f32 %v852_v23, %v1045_v10 }
 0x1ad   : > { %v598_v26 = vpop.f32.mrf.mxu1 }
 0x1ae   : > { %914 = vtanh.f32 %v607_v24  ;;  %v599_v27 = vadd.f32 %v1045_v10, %v598_v26 }
 0x1af   : > { %v903_v28 = vpop.eup %902  ;;  %v855_v29 = vpop.f32.mrf.mxu1 }
 0x1b0   : > { %v662_v30 = vmul.f32 %v903_v28, %v1055_v25  ;;  %916 = vtanh.f32 %v599_v27  ;;  %v620_v31 = vadd.f32 %v855_v29, %v1045_v10 }
 0x1b1   : > { %v905_v32 = vpop.eup %904  ;;  %v611_v33 = vpop.f32.mrf.mxu1 }
 0x1b2   : > { %678 = vst [vmem:[%s1061_s8 + $0x10] sm:$0xff] %v662_v30  ;;  %v660_v34 = vmul.f32 %v905_v32, %v1055_v25  ;;  %918 = vtanh.f32 %v620_v31  ;;  %v612_v35 = vadd.f32 %v1045_v10, %v611_v33 }
 0x1b3   : > { %v907_v36 = vpop.eup %906  ;;  %v856_v37 = vpop.f32.mrf.mxu1 }
 0x1b4   : > { %676 = vst [vmem:[%s1061_s8] sm:$0xff] %v660_v34  ;;  %v663_v38 = vmul.f32 %v907_v36, %v1055_v25  ;;  %920 = vtanh.f32 %v612_v35  ;;  %v623_v39 = vadd.f32 %v856_v37, %v1045_v10 }
 0x1b5   : > { %v909_v40 = vpop.eup %908  ;;  %v614_v41 = vpop.f32.mrf.mxu1 }
 0x1b6   : > { %679 = vst [vmem:[%s1061_s8 + $0x18] sm:$0xff] %v663_v38  ;;  %v661_v42 = vmul.f32 %v909_v40, %v1055_v25  ;;  %922 = vtanh.f32 %v623_v39  ;;  %v615_v43 = vadd.f32 %v1045_v10, %v614_v41 }
 0x1b7   : > { %v911_v44 = vpop.eup %910  ;;  %v859_v45 = vpop.f32.mrf.mxu1 }
 0x1b8   : > { %677 = vst [vmem:[%s1061_s8 + $0x8] sm:$0xff] %v661_v42  ;;  %v666_v46 = vmul.f32 %v911_v44, %v1055_v25  ;;  %924 = vtanh.f32 %v615_v43  ;;  %v636_v47 = vadd.f32 %v859_v45, %v1045_v10 }
 0x1b9   : > { %v913_v48 = vpop.eup %912  ;;  %v627_v49 = vpop.f32.mrf.mxu1 }
 0x1ba   : > { %682 = vst [vmem:[%s1061_s8 + $0x30] sm:$0xff] %v666_v46  ;;  %v664_v50 = vmul.f32 %v913_v48, %v1055_v25  ;;  %926 = vtanh.f32 %v636_v47  ;;  %v628_v51 = vadd.f32 %v1045_v10, %v627_v49 }
 0x1bb   : > { %v915_v52 = vpop.eup %914  ;;  %v860_v53 = vpop.f32.mrf.mxu1 }
 0x1bc   : > { %680 = vst [vmem:[%s1061_s8 + $0x20] sm:$0xff] %v664_v50  ;;  %v667_v54 = vmul.f32 %v915_v52, %v1055_v25  ;;  %928 = vtanh.f32 %v628_v51  ;;  %v639_v55 = vadd.f32 %v860_v53, %v1045_v10 }
 0x1bd   : > { %v917_v56 = vpop.eup %916  ;;  %v630_v57 = vpop.f32.mrf.mxu1 }
 0x1be   : > { %683 = vst [vmem:[%s1061_s8 + $0x38] sm:$0xff] %v667_v54  ;;  %v665_v58 = vmul.f32 %v917_v56, %v1055_v25  ;;  %930 = vtanh.f32 %v639_v55  ;;  %v631_v59 = vadd.f32 %v1045_v10, %v630_v57 }
 0x1bf   : > { %v919_v60 = vpop.eup %918 }
 0x1c0   : > { %681 = vst [vmem:[%s1061_s8 + $0x28] sm:$0xff] %v665_v58  ;;  %v670_v61 = vmul.f32 %v919_v60, %v1055_v25  ;;  %932 = vtanh.f32 %v631_v59 }
 0x1c1   : > { %v921_v62 = vpop.eup %920 }
 0x1c2   : > { %686 = vst [vmem:[%s1061_s8 + $0x50] sm:$0xff] %v670_v61  ;;  %v668_v63 = vmul.f32 %v921_v62, %v1055_v25 }
 0x1c3   : > { %v923_v0 = vpop.eup %922 }
 0x1c4   : > { %684 = vst [vmem:[%s1061_s8 + $0x40] sm:$0xff] %v668_v63  ;;  %v671_v1 = vmul.f32 %v923_v0, %v1055_v25 }
 0x1c5   : > { %v925_v2 = vpop.eup %924 }
 0x1c6   : > { %687 = vst [vmem:[%s1061_s8 + $0x58] sm:$0xff] %v671_v1  ;;  %v669_v3 = vmul.f32 %v925_v2, %v1055_v25 }
 0x1c7   : > { %v927_v4 = vpop.eup %926 }
 0x1c8   : > { %685 = vst [vmem:[%s1061_s8 + $0x48] sm:$0xff] %v669_v3  ;;  %v674_v5 = vmul.f32 %v927_v4, %v1055_v25 }
 0x1c9   : > { %v929_v6 = vpop.eup %928 }
 0x1ca   : > { %690 = vst [vmem:[%s1061_s8 + $0x70] sm:$0xff] %v674_v5  ;;  %v672_v7 = vmul.f32 %v929_v6, %v1055_v25 }
 0x1cb   : > { %v931_v8 = vpop.eup %930 }
 0x1cc   : > { %688 = vst [vmem:[%s1061_s8 + $0x60] sm:$0xff] %v672_v7  ;;  %v675_v9 = vmul.f32 %v931_v8, %v1055_v25 }
 0x1cd   : > { %v933_v10 = vpop.eup %932 }
 0x1ce   : > { %691 = vst [vmem:[%s1061_s8 + $0x78] sm:$0xff] %v675_v9  ;;  %v673_v11 = vmul.f32 %v933_v10, %v1055_v25 }
 0x1d0   : > { %689 = vst [vmem:[%s1061_s8 + $0x68] sm:$0xff] %v673_v11 }
 0x1d1 PF: > { %s17_s23 = sadd.s32 1, %s940_s23  }
 0x1d2   : > { %p14_p4 = scmp.ge.s32.totalorder %s17_s23, 4  }
 0x1d4   :  { %16 = sbr.rel (!%p14_p4) target bundleno = 2 (0x2), region = 74 }

</bundles_post_ra>
